<compile_context>
chip_gen: v5e
topology: v5e:2x2
jax: 0.10.0
libtpu: 0.0.40
codegen_flags: <defaults>
</compile_context>

<pallas_src>
import jax
import jax.numpy as jnp
from jax import lax
from jax.experimental import pallas as pl
from jax.experimental.pallas import tpu as pltpu


def _round_up(x, m):
    return ((x + m - 1) // m) * m


def rnn_kernel(xw_ref, whh_ref, why_ref, by_ref, h0_ref,
               out_ref, hfin_ref, hall_ref):
    """Serial recurrence + one batched output projection.

    xw_ref  : (seq, batch_p, hidden_p)  precomputed x_t @ W_xh + b_h (padded)
    whh_ref : (hidden_p, hidden_p)
    why_ref : (hidden_p, vocab_p)
    by_ref  : (1, vocab_p)
    h0_ref  : (batch_p, hidden_p)
    out_ref : (seq, batch_p, vocab_p)
    hfin_ref: (batch_p, hidden_p)
    hall_ref: VMEM scratch (seq, batch_p, hidden_p) holding every H_t
    """
    seq, batch_p, hidden_p = xw_ref.shape
    vocab_p = why_ref.shape[1]

    whh = whh_ref[...]  # loaded once; resident for the whole recurrence

    def step(t, h):
        # Only the recurrent matmul + tanh sit on the serial critical path.
        h_new = jnp.tanh(
            xw_ref[t] + jnp.dot(h, whh, preferred_element_type=jnp.float32))
        hall_ref[t] = h_new
        return h_new

    # seq is short here; full unroll lets the scheduler overlap adjacent steps.
    h_last = lax.fori_loop(0, seq, step, h0_ref[...], unroll=True)
    hfin_ref[...] = h_last

    # Output projection for all steps at once: one big lane-dense matmul.
    h_all = hall_ref[...].reshape(seq * batch_p, hidden_p)
    out = jnp.dot(h_all, why_ref[...], preferred_element_type=jnp.float32)
    out = out + by_ref[...]  # single broadcast add, not per-step
    out_ref[...] = out.reshape(seq, batch_p, vocab_p)


def rnn_forward(x_tokens, params, h0):
    """x_tokens: (batch, seq) int32. Returns (out (seq*batch, vocab), (H,))."""
    W_xh, W_hh, b_h, W_hy, b_y = params
    vocab_size, hidden_size = W_xh.shape
    batch, seq = x_tokens.shape

    hidden_p = _round_up(hidden_size, 128)
    vocab_p = _round_up(vocab_size, 128)
    batch_p = _round_up(batch, 8)

    # one_hot(x) @ W_xh is just a row gather of W_xh; fold b_h in here so the
    # serial kernel has no input matmul / bias add per step.
    xw = jnp.take(W_xh, x_tokens.T, axis=0) + b_h            # (seq, batch, hidden)

    # Zero-pad lane dims to 128 and batch to a multiple of 8 sublanes.
    xw_p = jnp.pad(xw, ((0, 0), (0, batch_p - batch), (0, hidden_p - hidden_size)))
    whh_p = jnp.pad(W_hh, ((0, hidden_p - hidden_size), (0, hidden_p - hidden_size)))
    why_p = jnp.pad(W_hy, ((0, hidden_p - hidden_size), (0, vocab_p - vocab_size)))
    by_p = jnp.pad(b_y.reshape(1, vocab_size), ((0, 0), (0, vocab_p - vocab_size)))
    h0_p = jnp.pad(h0, ((0, batch_p - batch), (0, hidden_p - hidden_size)))

    out_p, hfin_p = pl.pallas_call(
        rnn_kernel,
        out_shape=(
            jax.ShapeDtypeStruct((seq, batch_p, vocab_p), jnp.float32),
            jax.ShapeDtypeStruct((batch_p, hidden_p), jnp.float32),
        ),
        grid=(1,),
        in_specs=[
            pl.BlockSpec((seq, batch_p, hidden_p), lambda i: (0, 0, 0)),  # xw
            pl.BlockSpec((hidden_p, hidden_p), lambda i: (0, 0)),         # W_hh
            pl.BlockSpec((hidden_p, vocab_p), lambda i: (0, 0)),          # W_hy
            pl.BlockSpec((1, vocab_p), lambda i: (0, 0)),                 # b_y
            pl.BlockSpec((batch_p, hidden_p), lambda i: (0, 0)),          # H0
        ],
        out_specs=(
            pl.BlockSpec((seq, batch_p, vocab_p), lambda i: (0, 0, 0)),   # outputs
            pl.BlockSpec((batch_p, hidden_p), lambda i: (0, 0)),          # final H
        ),
        scratch_shapes=[pltpu.VMEM((seq, batch_p, hidden_p), jnp.float32)],
        compiler_params=pltpu.CompilerParams(
            dimension_semantics=("arbitrary",),
        ),
    )(xw_p, whh_p, why_p, by_p, h0_p)

    # torch.cat(outputs, 0): (seq, batch, vocab) -> (seq*batch, vocab), t-major.
    out = out_p[:, :batch, :vocab_size].reshape(seq * batch, vocab_size)
    h_fin = hfin_p[:batch, :hidden_size]
    return out, (h_fin,)


def rnn_reference(x_tokens, params, h0):
    W_xh, W_hh, b_h, W_hy, b_y = params
    vocab_size = W_xh.shape[0]
    onehot = jax.nn.one_hot(x_tokens.T, vocab_size, dtype=jnp.float32)
    H = h0
    outs = []
    for t in range(onehot.shape[0]):
        H = jnp.tanh(onehot[t] @ W_xh + H @ W_hh + b_h)
        outs.append(H @ W_hy + b_y)
    return jnp.concatenate(outs, axis=0), (H,)


if __name__ == "__main__":
    # Small deterministic setup.
    vocab_size = 32
    hidden_size = 32
    batch = 8
    seq = 8

    key = jax.random.PRNGKey(0)
    k_xh, k_hh, k_hy, k_x = jax.random.split(key, 4)

    W_xh = jax.random.normal(k_xh, (vocab_size, hidden_size), dtype=jnp.float32)
    W_hh = jax.random.normal(k_hh, (hidden_size, hidden_size), dtype=jnp.float32)
    b_h = jnp.zeros((hidden_size,), dtype=jnp.float32)
    W_hy = jax.random.normal(k_hy, (hidden_size, vocab_size), dtype=jnp.float32)
    b_y = jnp.zeros((vocab_size,), dtype=jnp.float32)
    params = (W_xh, W_hh, b_h, W_hy, b_y)

    x_tokens = jax.random.randint(k_x, (batch, seq), 0, vocab_size, dtype=jnp.int32)
    h0 = jnp.zeros((batch, hidden_size), dtype=jnp.float32)  # init_state_

    out, (h_fin,) = rnn_forward(x_tokens, params, h0)
    out = jax.block_until_ready(out)
    h_fin = jax.block_until_ready(h_fin)

    # Sanity check against pure-JAX reference.
    out_ref, (h_ref,) = rnn_reference(x_tokens, params, h0)
    assert out.shape == (seq * batch, vocab_size)
    assert h_fin.shape == (batch, hidden_size)
    assert jnp.allclose(out, out_ref, atol=1e-4, rtol=1e-4)
    assert jnp.allclose(h_fin, h_ref, atol=1e-4, rtol=1e-4)

    print("KERNEL_OK")
</pallas_src>

<mosaic_0001>
module attributes {stable_mosaic.version = 11 : i64} {
  func.func @rnn_kernel(%arg0: i32, %arg1: memref<8x8x128xf32, #tpu.memory_space<vmem>>, %arg2: memref<128x128xf32, #tpu.memory_space<vmem>>, %arg3: memref<128x128xf32, #tpu.memory_space<vmem>>, %arg4: memref<1x128xf32, #tpu.memory_space<vmem>>, %arg5: memref<8x128xf32, #tpu.memory_space<vmem>>, %arg6: memref<8x8x128xf32, #tpu.memory_space<vmem>>, %arg7: memref<8x128xf32, #tpu.memory_space<vmem>>, %arg8: memref<8x8x128xf32, #tpu.memory_space<vmem>>) attributes {dimension_semantics = [#tpu.dimension_semantics<arbitrary>], iteration_bounds = array<i64: 1>, scalar_prefetch = 0 : i64, scratch_operands = 1 : i64, tpu.core_type = #tpu.core_type<tc>, window_params = [{pipeline_mode = #tpu.pipeline_mode<synchronous>, transform_indices = @transform_0, window_bounds = array<i64: 8, 8, 128>}, {pipeline_mode = #tpu.pipeline_mode<synchronous>, transform_indices = @transform_1, window_bounds = array<i64: 128, 128>}, {pipeline_mode = #tpu.pipeline_mode<synchronous>, transform_indices = @transform_2, window_bounds = array<i64: 128, 128>}, {pipeline_mode = #tpu.pipeline_mode<synchronous>, transform_indices = @transform_3, window_bounds = array<i64: 1, 128>}, {pipeline_mode = #tpu.pipeline_mode<synchronous>, transform_indices = @transform_4, window_bounds = array<i64: 8, 128>}, {pipeline_mode = #tpu.pipeline_mode<synchronous>, transform_indices = @transform_5, window_bounds = array<i64: 8, 8, 128>}, {pipeline_mode = #tpu.pipeline_mode<synchronous>, transform_indices = @transform_6, window_bounds = array<i64: 8, 128>}]} {
    %c0 = arith.constant 0 : index
    %c0_0 = arith.constant 0 : index
    %0 = vector.load %arg2[%c0, %c0_0] : memref<128x128xf32, #tpu.memory_space<vmem>>, vector<128x128xf32>
    %c0_1 = arith.constant 0 : index
    %c0_2 = arith.constant 0 : index
    %1 = vector.load %arg5[%c0_1, %c0_2] : memref<8x128xf32, #tpu.memory_space<vmem>>, vector<8x128xf32>
    %c0_i32 = arith.constant 0 : i32
    %2 = arith.index_cast %c0_i32 : i32 to index
    %c0_3 = arith.constant 0 : index
    %c0_4 = arith.constant 0 : index
    %3 = vector.load %arg1[%2, %c0_3, %c0_4] : memref<8x8x128xf32, #tpu.memory_space<vmem>>, vector<1x8x128xf32>
    %4 = vector.shape_cast %3 : vector<1x8x128xf32> to vector<8x128xf32>
    %cst = arith.constant dense<0.000000e+00> : vector<8x128xf32>
    %5 = tpu.matmul %1, %0, %cst {dimension_numbers = #tpu.dot_dimension_numbers<[1], [0], [0], [1], [0, 0, 1, 1], [], []>} : vector<8x128xf32>, vector<128x128xf32>, vector<8x128xf32> -> vector<8x128xf32>
    %6 = arith.addf %4, %5 : vector<8x128xf32>
    %7 = math.tanh %6 : vector<8x128xf32>
    %8 = arith.index_cast %c0_i32 : i32 to index
    %c0_5 = arith.constant 0 : index
    %c0_6 = arith.constant 0 : index
    %9 = vector.load %arg8[%8, %c0_5, %c0_6] : memref<8x8x128xf32, #tpu.memory_space<vmem>>, vector<1x8x128xf32>
    %10 = vector.shape_cast %9 : vector<1x8x128xf32> to vector<8x128xf32>
    %11 = vector.shape_cast %7 : vector<8x128xf32> to vector<1x8x128xf32>
    tpu.vector_store %arg8[%8, %c0_5, %c0_6], %11 {strides = array<i32>} : memref<8x8x128xf32, #tpu.memory_space<vmem>>, vector<1x8x128xf32>,
    %c1_i32 = arith.constant 1 : i32
    %12 = arith.index_cast %c1_i32 : i32 to index
    %c0_7 = arith.constant 0 : index
    %c0_8 = arith.constant 0 : index
    %13 = vector.load %arg1[%12, %c0_7, %c0_8] : memref<8x8x128xf32, #tpu.memory_space<vmem>>, vector<1x8x128xf32>
    %14 = vector.shape_cast %13 : vector<1x8x128xf32> to vector<8x128xf32>
    %cst_9 = arith.constant dense<0.000000e+00> : vector<8x128xf32>
    %15 = tpu.matmul %7, %0, %cst_9 {dimension_numbers = #tpu.dot_dimension_numbers<[1], [0], [0], [1], [0, 0, 1, 1], [], []>} : vector<8x128xf32>, vector<128x128xf32>, vector<8x128xf32> -> vector<8x128xf32>
    %16 = arith.addf %14, %15 : vector<8x128xf32>
    %17 = math.tanh %16 : vector<8x128xf32>
    %18 = arith.index_cast %c1_i32 : i32 to index
    %c0_10 = arith.constant 0 : index
    %c0_11 = arith.constant 0 : index
    %19 = vector.load %arg8[%18, %c0_10, %c0_11] : memref<8x8x128xf32, #tpu.memory_space<vmem>>, vector<1x8x128xf32>
    %20 = vector.shape_cast %19 : vector<1x8x128xf32> to vector<8x128xf32>
    %21 = vector.shape_cast %17 : vector<8x128xf32> to vector<1x8x128xf32>
    tpu.vector_store %arg8[%18, %c0_10, %c0_11], %21 {strides = array<i32>} : memref<8x8x128xf32, #tpu.memory_space<vmem>>, vector<1x8x128xf32>,
    %c2_i32 = arith.constant 2 : i32
    %22 = arith.index_cast %c2_i32 : i32 to index
    %c0_12 = arith.constant 0 : index
    %c0_13 = arith.constant 0 : index
    %23 = vector.load %arg1[%22, %c0_12, %c0_13] : memref<8x8x128xf32, #tpu.memory_space<vmem>>, vector<1x8x128xf32>
    %24 = vector.shape_cast %23 : vector<1x8x128xf32> to vector<8x128xf32>
    %cst_14 = arith.constant dense<0.000000e+00> : vector<8x128xf32>
    %25 = tpu.matmul %17, %0, %cst_14 {dimension_numbers = #tpu.dot_dimension_numbers<[1], [0], [0], [1], [0, 0, 1, 1], [], []>} : vector<8x128xf32>, vector<128x128xf32>, vector<8x128xf32> -> vector<8x128xf32>
    %26 = arith.addf %24, %25 : vector<8x128xf32>
    %27 = math.tanh %26 : vector<8x128xf32>
    %28 = arith.index_cast %c2_i32 : i32 to index
    %c0_15 = arith.constant 0 : index
    %c0_16 = arith.constant 0 : index
    %29 = vector.load %arg8[%28, %c0_15, %c0_16] : memref<8x8x128xf32, #tpu.memory_space<vmem>>, vector<1x8x128xf32>
    %30 = vector.shape_cast %29 : vector<1x8x128xf32> to vector<8x128xf32>
    %31 = vector.shape_cast %27 : vector<8x128xf32> to vector<1x8x128xf32>
    tpu.vector_store %arg8[%28, %c0_15, %c0_16], %31 {strides = array<i32>} : memref<8x8x128xf32, #tpu.memory_space<vmem>>, vector<1x8x128xf32>,
    %c3_i32 = arith.constant 3 : i32
    %32 = arith.index_cast %c3_i32 : i32 to index
    %c0_17 = arith.constant 0 : index
    %c0_18 = arith.constant 0 : index
    %33 = vector.load %arg1[%32, %c0_17, %c0_18] : memref<8x8x128xf32, #tpu.memory_space<vmem>>, vector<1x8x128xf32>
    %34 = vector.shape_cast %33 : vector<1x8x128xf32> to vector<8x128xf32>
    %cst_19 = arith.constant dense<0.000000e+00> : vector<8x128xf32>
    %35 = tpu.matmul %27, %0, %cst_19 {dimension_numbers = #tpu.dot_dimension_numbers<[1], [0], [0], [1], [0, 0, 1, 1], [], []>} : vector<8x128xf32>, vector<128x128xf32>, vector<8x128xf32> -> vector<8x128xf32>
    %36 = arith.addf %34, %35 : vector<8x128xf32>
    %37 = math.tanh %36 : vector<8x128xf32>
    %38 = arith.index_cast %c3_i32 : i32 to index
    %c0_20 = arith.constant 0 : index
    %c0_21 = arith.constant 0 : index
    %39 = vector.load %arg8[%38, %c0_20, %c0_21] : memref<8x8x128xf32, #tpu.memory_space<vmem>>, vector<1x8x128xf32>
    %40 = vector.shape_cast %39 : vector<1x8x128xf32> to vector<8x128xf32>
    %41 = vector.shape_cast %37 : vector<8x128xf32> to vector<1x8x128xf32>
    tpu.vector_store %arg8[%38, %c0_20, %c0_21], %41 {strides = array<i32>} : memref<8x8x128xf32, #tpu.memory_space<vmem>>, vector<1x8x128xf32>,
    %c4_i32 = arith.constant 4 : i32
    %42 = arith.index_cast %c4_i32 : i32 to index
    %c0_22 = arith.constant 0 : index
    %c0_23 = arith.constant 0 : index
    %43 = vector.load %arg1[%42, %c0_22, %c0_23] : memref<8x8x128xf32, #tpu.memory_space<vmem>>, vector<1x8x128xf32>
    %44 = vector.shape_cast %43 : vector<1x8x128xf32> to vector<8x128xf32>
    %cst_24 = arith.constant dense<0.000000e+00> : vector<8x128xf32>
    %45 = tpu.matmul %37, %0, %cst_24 {dimension_numbers = #tpu.dot_dimension_numbers<[1], [0], [0], [1], [0, 0, 1, 1], [], []>} : vector<8x128xf32>, vector<128x128xf32>, vector<8x128xf32> -> vector<8x128xf32>
    %46 = arith.addf %44, %45 : vector<8x128xf32>
    %47 = math.tanh %46 : vector<8x128xf32>
    %48 = arith.index_cast %c4_i32 : i32 to index
    %c0_25 = arith.constant 0 : index
    %c0_26 = arith.constant 0 : index
    %49 = vector.load %arg8[%48, %c0_25, %c0_26] : memref<8x8x128xf32, #tpu.memory_space<vmem>>, vector<1x8x128xf32>
    %50 = vector.shape_cast %49 : vector<1x8x128xf32> to vector<8x128xf32>
    %51 = vector.shape_cast %47 : vector<8x128xf32> to vector<1x8x128xf32>
    tpu.vector_store %arg8[%48, %c0_25, %c0_26], %51 {strides = array<i32>} : memref<8x8x128xf32, #tpu.memory_space<vmem>>, vector<1x8x128xf32>,
    %c5_i32 = arith.constant 5 : i32
    %52 = arith.index_cast %c5_i32 : i32 to index
    %c0_27 = arith.constant 0 : index
    %c0_28 = arith.constant 0 : index
    %53 = vector.load %arg1[%52, %c0_27, %c0_28] : memref<8x8x128xf32, #tpu.memory_space<vmem>>, vector<1x8x128xf32>
    %54 = vector.shape_cast %53 : vector<1x8x128xf32> to vector<8x128xf32>
    %cst_29 = arith.constant dense<0.000000e+00> : vector<8x128xf32>
    %55 = tpu.matmul %47, %0, %cst_29 {dimension_numbers = #tpu.dot_dimension_numbers<[1], [0], [0], [1], [0, 0, 1, 1], [], []>} : vector<8x128xf32>, vector<128x128xf32>, vector<8x128xf32> -> vector<8x128xf32>
    %56 = arith.addf %54, %55 : vector<8x128xf32>
    %57 = math.tanh %56 : vector<8x128xf32>
    %58 = arith.index_cast %c5_i32 : i32 to index
    %c0_30 = arith.constant 0 : index
    %c0_31 = arith.constant 0 : index
    %59 = vector.load %arg8[%58, %c0_30, %c0_31] : memref<8x8x128xf32, #tpu.memory_space<vmem>>, vector<1x8x128xf32>
    %60 = vector.shape_cast %59 : vector<1x8x128xf32> to vector<8x128xf32>
    %61 = vector.shape_cast %57 : vector<8x128xf32> to vector<1x8x128xf32>
    tpu.vector_store %arg8[%58, %c0_30, %c0_31], %61 {strides = array<i32>} : memref<8x8x128xf32, #tpu.memory_space<vmem>>, vector<1x8x128xf32>,
    %c6_i32 = arith.constant 6 : i32
    %62 = arith.index_cast %c6_i32 : i32 to index
    %c0_32 = arith.constant 0 : index
    %c0_33 = arith.constant 0 : index
    %63 = vector.load %arg1[%62, %c0_32, %c0_33] : memref<8x8x128xf32, #tpu.memory_space<vmem>>, vector<1x8x128xf32>
    %64 = vector.shape_cast %63 : vector<1x8x128xf32> to vector<8x128xf32>
    %cst_34 = arith.constant dense<0.000000e+00> : vector<8x128xf32>
    %65 = tpu.matmul %57, %0, %cst_34 {dimension_numbers = #tpu.dot_dimension_numbers<[1], [0], [0], [1], [0, 0, 1, 1], [], []>} : vector<8x128xf32>, vector<128x128xf32>, vector<8x128xf32> -> vector<8x128xf32>
    %66 = arith.addf %64, %65 : vector<8x128xf32>
    %67 = math.tanh %66 : vector<8x128xf32>
    %68 = arith.index_cast %c6_i32 : i32 to index
    %c0_35 = arith.constant 0 : index
    %c0_36 = arith.constant 0 : index
    %69 = vector.load %arg8[%68, %c0_35, %c0_36] : memref<8x8x128xf32, #tpu.memory_space<vmem>>, vector<1x8x128xf32>
    %70 = vector.shape_cast %69 : vector<1x8x128xf32> to vector<8x128xf32>
    %71 = vector.shape_cast %67 : vector<8x128xf32> to vector<1x8x128xf32>
    tpu.vector_store %arg8[%68, %c0_35, %c0_36], %71 {strides = array<i32>} : memref<8x8x128xf32, #tpu.memory_space<vmem>>, vector<1x8x128xf32>,
    %c7_i32 = arith.constant 7 : i32
    %72 = arith.index_cast %c7_i32 : i32 to index
    %c0_37 = arith.constant 0 : index
    %c0_38 = arith.constant 0 : index
    %73 = vector.load %arg1[%72, %c0_37, %c0_38] : memref<8x8x128xf32, #tpu.memory_space<vmem>>, vector<1x8x128xf32>
    %74 = vector.shape_cast %73 : vector<1x8x128xf32> to vector<8x128xf32>
    %cst_39 = arith.constant dense<0.000000e+00> : vector<8x128xf32>
    %75 = tpu.matmul %67, %0, %cst_39 {dimension_numbers = #tpu.dot_dimension_numbers<[1], [0], [0], [1], [0, 0, 1, 1], [], []>} : vector<8x128xf32>, vector<128x128xf32>, vector<8x128xf32> -> vector<8x128xf32>
    %76 = arith.addf %74, %75 : vector<8x128xf32>
    %77 = math.tanh %76 : vector<8x128xf32>
    %78 = arith.index_cast %c7_i32 : i32 to index
    %c0_40 = arith.constant 0 : index
    %c0_41 = arith.constant 0 : index
    %79 = vector.load %arg8[%78, %c0_40, %c0_41] : memref<8x8x128xf32, #tpu.memory_space<vmem>>, vector<1x8x128xf32>
    %80 = vector.shape_cast %79 : vector<1x8x128xf32> to vector<8x128xf32>
    %81 = vector.shape_cast %77 : vector<8x128xf32> to vector<1x8x128xf32>
    tpu.vector_store %arg8[%78, %c0_40, %c0_41], %81 {strides = array<i32>} : memref<8x8x128xf32, #tpu.memory_space<vmem>>, vector<1x8x128xf32>,
    %c8_i32 = arith.constant 8 : i32
    %c0_42 = arith.constant 0 : index
    %c0_43 = arith.constant 0 : index
    %82 = vector.load %arg7[%c0_42, %c0_43] : memref<8x128xf32, #tpu.memory_space<vmem>>, vector<8x128xf32>
    tpu.vector_store %arg7[%c0_42, %c0_43], %77 {strides = array<i32>} : memref<8x128xf32, #tpu.memory_space<vmem>>, vector<8x128xf32>,
    %c0_44 = arith.constant 0 : index
    %c0_45 = arith.constant 0 : index
    %c0_46 = arith.constant 0 : index
    %83 = vector.load %arg8[%c0_44, %c0_45, %c0_46] : memref<8x8x128xf32, #tpu.memory_space<vmem>>, vector<8x8x128xf32>
    %84 = vector.shape_cast %83 : vector<8x8x128xf32> to vector<64x128xf32>
    %c0_47 = arith.constant 0 : index
    %c0_48 = arith.constant 0 : index
    %85 = vector.load %arg3[%c0_47, %c0_48] : memref<128x128xf32, #tpu.memory_space<vmem>>, vector<128x128xf32>
    %cst_49 = arith.constant dense<0.000000e+00> : vector<64x128xf32>
    %86 = tpu.matmul %84, %85, %cst_49 {dimension_numbers = #tpu.dot_dimension_numbers<[1], [0], [0], [1], [0, 0, 1, 1], [], []>} : vector<64x128xf32>, vector<128x128xf32>, vector<64x128xf32> -> vector<64x128xf32>
    %c0_50 = arith.constant 0 : index
    %c0_51 = arith.constant 0 : index
    %87 = vector.load %arg4[%c0_50, %c0_51] : memref<1x128xf32, #tpu.memory_space<vmem>>, vector<1x128xf32>
    %88 = vector.broadcast %87 : vector<1x128xf32> to vector<64x128xf32>
    %89 = arith.addf %86, %88 : vector<64x128xf32>
    %90 = vector.shape_cast %89 : vector<64x128xf32> to vector<8x8x128xf32>
    %c0_52 = arith.constant 0 : index
    %c0_53 = arith.constant 0 : index
    %c0_54 = arith.constant 0 : index
    %91 = vector.load %arg6[%c0_52, %c0_53, %c0_54] : memref<8x8x128xf32, #tpu.memory_space<vmem>>, vector<8x8x128xf32>
    tpu.vector_store %arg6[%c0_52, %c0_53, %c0_54], %90 {strides = array<i32>} : memref<8x8x128xf32, #tpu.memory_space<vmem>>, vector<8x8x128xf32>,
    return
  }
  func.func @transform_0(%arg0: i32) -> (i32, i32, i32) {
    %c0_i32 = arith.constant 0 : i32
    %c0_i32_0 = arith.constant 0 : i32
    %c0_i32_1 = arith.constant 0 : i32
    %c0_i32_2 = arith.constant 0 : i32
    return %c0_i32, %c0_i32_0, %c0_i32_1 : i32, i32, i32
  }
  func.func @transform_1(%arg0: i32) -> (i32, i32) {
    %c0_i32 = arith.constant 0 : i32
    %c0_i32_0 = arith.constant 0 : i32
    %c0_i32_1 = arith.constant 0 : i32
    return %c0_i32, %c0_i32_0 : i32, i32
  }
  func.func @transform_2(%arg0: i32) -> (i32, i32) {
    %c0_i32 = arith.constant 0 : i32
    %c0_i32_0 = arith.constant 0 : i32
    %c0_i32_1 = arith.constant 0 : i32
    return %c0_i32, %c0_i32_0 : i32, i32
  }
  func.func @transform_3(%arg0: i32) -> (i32, i32) {
    %c0_i32 = arith.constant 0 : i32
    %c0_i32_0 = arith.constant 0 : i32
    %c0_i32_1 = arith.constant 0 : i32
    return %c0_i32, %c0_i32_0 : i32, i32
  }
  func.func @transform_4(%arg0: i32) -> (i32, i32) {
    %c0_i32 = arith.constant 0 : i32
    %c0_i32_0 = arith.constant 0 : i32
    %c0_i32_1 = arith.constant 0 : i32
    return %c0_i32, %c0_i32_0 : i32, i32
  }
  func.func @transform_5(%arg0: i32) -> (i32, i32, i32) {
    %c0_i32 = arith.constant 0 : i32
    %c0_i32_0 = arith.constant 0 : i32
    %c0_i32_1 = arith.constant 0 : i32
    %c0_i32_2 = arith.constant 0 : i32
    return %c0_i32, %c0_i32_0, %c0_i32_1 : i32, i32, i32
  }
  func.func @transform_6(%arg0: i32) -> (i32, i32) {
    %c0_i32 = arith.constant 0 : i32
    %c0_i32_0 = arith.constant 0 : i32
    %c0_i32_1 = arith.constant 0 : i32
    return %c0_i32, %c0_i32_0 : i32, i32
  }
}

</mosaic_0001>

<bundles_post_ra>
// kernel: tpu_custom_call.1
= control target key start
LH: loop header
LB: loop body
LE: loop exit
PB: predicated region body
PF: predicated region fallthrough
CT: control target
= control target key end

     0   :  { %12 = vsyncpa [#allocation4], 0  ;;  %s848_s0 = inlined_call_operand.hbm [shape: f32[8,8,128], index: 0, kind: input, shape index: {}]   ;;  %s849_s1 = inlined_call_operand.hbm [shape: f32[128,128], index: 1, kind: input, shape index: {}]   ;;  %s850_s2 = inlined_call_operand.hbm [shape: f32[128,128], index: 2, kind: input, shape index: {}]   ;;  %s851_s3 = inlined_call_operand.vmem [shape: f32[1,128], index: 3, kind: input, shape index: {}]   ;;  %s852_s4 = inlined_call_operand.hbm [shape: f32[8,128], index: 4, kind: input, shape index: {}]   ;;  %s853_s5 = inlined_call_operand.hbm [shape: f32[8,8,128], index: 5, kind: output, shape index: {0}]   ;;  %s854_s6 = inlined_call_operand.hbm [shape: f32[8,128], index: 6, kind: output, shape index: {1}]  }
   0x1   :  { %13 = vsyncpa [#allocation7], 0 }
   0x2   :  { %14 = vsyncpa [#allocation10], 0 }
   0x3   :  { %15 = vsyncpa [#allocation5], 0 }
   0x4   :  { %16 = vsyncpa [#allocation13], 0  ;;  %s34_s23 = sshll.u32 %s849_s1, 4  ;;  %s602_s24 = smov [#allocation6]   ;;  %s35_s23 = int_to_ptr.hbm [resolvable:$true] %s34_s23 }
   0x5   :  { %s36_s25 = sshll.u32 %s602_s24, 4  ;;  %s21_s28 = sshll.u32 %s848_s0, 4  ;;  %s37_s25 = int_to_ptr.vmem [resolvable:$true] %s36_s25  ;;  %s22_s28 = int_to_ptr.hbm [resolvable:$true] %s21_s28 }
   0x6   :  { %s603_s29 = smov 128   ;;  %s604_s30 = smov 8  }
   0x7   :  { %42 = dma.hbm_to_vmem [thread:$0]  %s35_s23, 2048, %s37_s25, [#allocation7], %s603_s29, %s603_s29, %s604_s30  }
   0x8   :  { %s605_s7 = smov [#allocation3]   ;;  %s47_s1 = sshll.u32 %s850_s2, 4  ;;  %s48_s1 = int_to_ptr.hbm [resolvable:$true] %s47_s1 }
   0x9   :  { %s23_s8 = sshll.u32 %s605_s7, 4  ;;  %s63_s12 = sshll.u32 %s852_s4, 4  ;;  %s24_s8 = int_to_ptr.vmem [resolvable:$true] %s23_s8  ;;  %s64_s12 = int_to_ptr.hbm [resolvable:$true] %s63_s12 }
   0xa   :  { %29 = dma.hbm_to_vmem [thread:$0]  %s22_s28, 1024, %s24_s8, [#allocation4], %s603_s29, %s603_s29, %s604_s30  }
   0xb   :  { %s606_s13 = smov [#allocation8]   ;;  %s607_s15 = smov [#allocation9]  }
   0xc   :  { %s49_s14 = sshll.u32 %s606_s13, 4  ;;  %s65_s2 = sshll.u32 %s607_s15, 4  ;;  %s50_s14 = int_to_ptr.vmem [resolvable:$true] %s49_s14  ;;  %s66_s2 = int_to_ptr.vmem [resolvable:$true] %s65_s2 }
   0xd   :  { %55 = dma.hbm_to_vmem [thread:$0]  %s48_s1, 2048, %s50_s14, [#allocation7], %s603_s29, %s603_s29, %s604_s30  }
   0xe   :  { %68 = dma.hbm_to_vmem [thread:$0]  %s64_s12, 128, %s66_s2, [#allocation10]  }
   0xf   :  { %592 = dma.done.wait [#allocation4], 1024  }
  0x10   :  { %593 = vsyncadd [#allocation4], 4294966272 }
  0x11   :  { %594 = dma.done.wait [#allocation7], 4096  }
  0x12   :  { %595 = vsyncadd [#allocation7], 4294963200 }
  0x13   :  { %596 = dma.done.wait [#allocation10], 128  }
  0x14   :  { %597 = vsyncadd [#allocation10], 4294967168  ;;  %v666_v0 = vld [vmem:[#allocation6 + $0x78] sm:$0xff]  ;;  %v668_v1 = vld [vmem:[#allocation6 + $0x70] sm:$0xff]  ;;  %s406_s20 = sshll.u32 %s854_s6, 4  ;;  %s609_s21 = smov [#allocation11]   ;;  %s407_s20 = int_to_ptr.hbm [resolvable:$true] %s406_s20 }
  0x15   :  { %103 = vmatpush.msra.mxu1 %v666_v0  ;;  %154 = vmatpush.msra.mxu2 %v666_v0  ;;  %v672_v2 = vld [vmem:[#allocation6 + $0x68] sm:$0xff]  ;;  %v677_v3 = vld [vmem:[#allocation6 + $0x60] sm:$0xff]  ;;  %v332_v4 = vld [vmem:[#allocation8 + $0x78] sm:$0xff]  ;;  %s390_s22 = sshll.u32 %s609_s21, 4  ;;  %s392_s25 = sshll.u32 %s853_s5, 4  ;;  %s391_s22 = int_to_ptr.vmem [resolvable:$true] %s390_s22  ;;  %s393_s25 = int_to_ptr.hbm [resolvable:$true] %s392_s25 }
  0x16   :  { %180 = vmatpush.msra.mxu3 %v666_v0  ;;  %v682_v5 = vld [vmem:[#allocation6 + $0x58] sm:$0xff]  ;;  %337 = vmatpush.msra.mxu0 %v332_v4  ;;  %v331_v6 = vld [vmem:[#allocation8 + $0x70] sm:$0xff]  ;;  %v330_v7 = vld [vmem:[#allocation8 + $0x68] sm:$0xff] }
  0x17   :  { %104 = vmatpush.msra.mxu1 %v668_v1  ;;  %155 = vmatpush.msra.mxu2 %v668_v1  ;;  %v687_v8 = vld [vmem:[#allocation6 + $0x50] sm:$0xff]  ;;  %v329_v9 = vld [vmem:[#allocation8 + $0x60] sm:$0xff]  ;;  %v692_v10 = vld [vmem:[#allocation6 + $0x48] sm:$0xff] }
  0x18   :  { %181 = vmatpush.msra.mxu3 %v668_v1  ;;  %338 = vmatpush.msra.mxu0 %v331_v6  ;;  %v328_v11 = vld [vmem:[#allocation8 + $0x58] sm:$0xff]  ;;  %v697_v12 = vld [vmem:[#allocation6 + $0x40] sm:$0xff]  ;;  %v327_v13 = vld [vmem:[#allocation8 + $0x50] sm:$0xff] }
  0x19   :  { %105 = vmatpush.msra.mxu1 %v672_v2  ;;  %156 = vmatpush.msra.mxu2 %v672_v2  ;;  %v702_v14 = vld [vmem:[#allocation6 + $0x38] sm:$0xff]  ;;  %v326_v15 = vld [vmem:[#allocation8 + $0x48] sm:$0xff]  ;;  %v707_v16 = vld [vmem:[#allocation6 + $0x30] sm:$0xff] }
  0x1a   :  { %182 = vmatpush.msra.mxu3 %v672_v2  ;;  %339 = vmatpush.msra.mxu0 %v330_v7  ;;  %v325_v17 = vld [vmem:[#allocation8 + $0x40] sm:$0xff]  ;;  %v712_v18 = vld [vmem:[#allocation6 + $0x28] sm:$0xff]  ;;  %v324_v19 = vld [vmem:[#allocation8 + $0x38] sm:$0xff] }
  0x1b   :  { %106 = vmatpush.msra.mxu1 %v677_v3  ;;  %157 = vmatpush.msra.mxu2 %v677_v3  ;;  %v717_v20 = vld [vmem:[#allocation6 + $0x20] sm:$0xff]  ;;  %v323_v21 = vld [vmem:[#allocation8 + $0x30] sm:$0xff]  ;;  %v722_v22 = vld [vmem:[#allocation6 + $0x18] sm:$0xff] }
  0x1c   :  { %183 = vmatpush.msra.mxu3 %v677_v3  ;;  %340 = vmatpush.msra.mxu0 %v329_v9  ;;  %v322_v23 = vld [vmem:[#allocation8 + $0x28] sm:$0xff]  ;;  %v727_v24 = vld [vmem:[#allocation6 + $0x10] sm:$0xff]  ;;  %v737_v26 = vld [vmem:[#allocation6] sm:$0xff] }
  0x1d   :  { %107 = vmatpush.msra.mxu1 %v682_v5  ;;  %158 = vmatpush.msra.mxu2 %v682_v5  ;;  %v732_v25 = vld [vmem:[#allocation6 + $0x8] sm:$0xff]  ;;  %v101_v27 = vld [vmem:[#allocation9] sm:$0xff]  ;;  %v320_v29 = vld [vmem:[#allocation8 + $0x18] sm:$0xff] }
  0x1e   :  { %184 = vmatpush.msra.mxu3 %v682_v5  ;;  %341 = vmatpush.msra.mxu0 %v328_v11  ;;  %v321_v28 = vld [vmem:[#allocation8 + $0x20] sm:$0xff]  ;;  %v319_v30 = vld [vmem:[#allocation8 + $0x10] sm:$0xff]  ;;  %v318_v31 = vld [vmem:[#allocation8 + $0x8] sm:$0xff] }
  0x1f   :  { %108 = vmatpush.msra.mxu1 %v687_v8  ;;  %159 = vmatpush.msra.mxu2 %v687_v8  ;;  %v317_v32 = vld [vmem:[#allocation8] sm:$0xff]  ;;  %v127_v38 = vld [vmem:[#allocation3 + $0x8] sm:$0xff]  ;;  %v153_v46 = vld [vmem:[#allocation3 + $0x10] sm:$0xff] }
  0x20   :  { %185 = vmatpush.msra.mxu3 %v687_v8  ;;  %342 = vmatpush.msra.mxu0 %v327_v13  ;;  %v102_v33 = vld [vmem:[#allocation3] sm:$0xff]  ;;  %v179_v52 = vld [vmem:[#allocation3 + $0x18] sm:$0xff]  ;;  %v231_v62 = vld [vmem:[#allocation3 + $0x28] sm:$0xff] }
  0x21   :  { %109 = vmatpush.msra.mxu1 %v692_v10  ;;  %160 = vmatpush.msra.mxu2 %v692_v10  ;;  %v813_v37 = vld [vmem:[%s851_s3] ss:$0 sm:$0xff]  ;;  %v257_v6 = vld [vmem:[#allocation3 + $0x30] sm:$0xff]  ;;  %s608_s3 = smov [#allocation12]  }
  0x22   :  { %186 = vmatpush.msra.mxu3 %v692_v10  ;;  %343 = vmatpush.msra.mxu0 %v326_v15  ;;  %v205_v58 = vld [vmem:[#allocation3 + $0x20] sm:$0xff]  ;;  %s404_s17 = sshll.u32 %s608_s3, 4  ;;  %s405_s17 = int_to_ptr.vmem [resolvable:$true] %s404_s17 }
  0x23   :  { %110 = vmatpush.msra.mxu1 %v697_v12  ;;  %161 = vmatpush.msra.mxu2 %v697_v12 }
  0x24   :  { %187 = vmatpush.msra.mxu3 %v697_v12  ;;  %344 = vmatpush.msra.mxu0 %v325_v17 }
  0x25   :  { %111 = vmatpush.msra.mxu1 %v702_v14  ;;  %162 = vmatpush.msra.mxu2 %v702_v14 }
  0x26   :  { %188 = vmatpush.msra.mxu3 %v702_v14  ;;  %345 = vmatpush.msra.mxu0 %v324_v19 }
  0x27   :  { %112 = vmatpush.msra.mxu1 %v707_v16  ;;  %163 = vmatpush.msra.mxu2 %v707_v16 }
  0x28   :  { %189 = vmatpush.msra.mxu3 %v707_v16  ;;  %346 = vmatpush.msra.mxu0 %v323_v21 }
  0x29   :  { %113 = vmatpush.msra.mxu1 %v712_v18  ;;  %164 = vmatpush.msra.mxu2 %v712_v18 }
  0x2a   :  { %190 = vmatpush.msra.mxu3 %v712_v18  ;;  %347 = vmatpush.msra.mxu0 %v322_v23 }
  0x2b   :  { %114 = vmatpush.msra.mxu1 %v717_v20  ;;  %165 = vmatpush.msra.mxu2 %v717_v20 }
  0x2c   :  { %191 = vmatpush.msra.mxu3 %v717_v20  ;;  %348 = vmatpush.msra.mxu0 %v321_v28 }
  0x2d   :  { %115 = vmatpush.msra.mxu1 %v722_v22  ;;  %166 = vmatpush.msra.mxu2 %v722_v22 }
  0x2e   :  { %192 = vmatpush.msra.mxu3 %v722_v22  ;;  %349 = vmatpush.msra.mxu0 %v320_v29 }
  0x2f   :  { %116 = vmatpush.msra.mxu1 %v727_v24  ;;  %167 = vmatpush.msra.mxu2 %v727_v24 }
  0x30   :  { %193 = vmatpush.msra.mxu3 %v727_v24  ;;  %350 = vmatpush.msra.mxu0 %v319_v30 }
  0x31   :  { %117 = vmatpush.msra.mxu1 %v732_v25  ;;  %168 = vmatpush.msra.mxu2 %v732_v25 }
  0x32   :  { %194 = vmatpush.msra.mxu3 %v732_v25  ;;  %351 = vmatpush.msra.mxu0 %v318_v31 }
  0x33   :  { %118 = vmatpush.msra.mxu1 %v737_v26  ;;  %169 = vmatpush.msra.mxu2 %v737_v26 }
  0x34   :  { %119 = vmatmul.f32.vlgmr.msra.gmra.mxu1 %v101_v27  ;;  %195 = vmatpush.msra.mxu3 %v737_v26 }
  0x35   :  { %128 = vmatpush.msrb.mxu1 %v666_v0  ;;  %206 = vmatpush.msrb.mxu2 %v666_v0 }
  0x36   :  { %284 = vmatpush.msrb.mxu3 %v666_v0  ;;  %352 = vmatpush.msra.mxu0 %v317_v32 }
  0x37   :  { %129 = vmatpush.msrb.mxu1 %v668_v1  ;;  %207 = vmatpush.msrb.mxu2 %v668_v1 }
  0x38   :  { %285 = vmatpush.msrb.mxu3 %v668_v1 }
  0x39   :  { %130 = vmatpush.msrb.mxu1 %v672_v2  ;;  %208 = vmatpush.msrb.mxu2 %v672_v2 }
  0x3a   :  { %286 = vmatpush.msrb.mxu3 %v672_v2 }
  0x3b   :  { %131 = vmatpush.msrb.mxu1 %v677_v3  ;;  %209 = vmatpush.msrb.mxu2 %v677_v3 }
  0x3c   :  { %287 = vmatpush.msrb.mxu3 %v677_v3 }
  0x3d   :  { %132 = vmatpush.msrb.mxu1 %v682_v5  ;;  %210 = vmatpush.msrb.mxu2 %v682_v5 }
  0x3e   :  { %288 = vmatpush.msrb.mxu3 %v682_v5 }
  0x3f   :  { %133 = vmatpush.msrb.mxu1 %v687_v8  ;;  %211 = vmatpush.msrb.mxu2 %v687_v8 }
  0x40   :  { %289 = vmatpush.msrb.mxu3 %v687_v8 }
  0x41   :  { %134 = vmatpush.msrb.mxu1 %v692_v10  ;;  %212 = vmatpush.msrb.mxu2 %v692_v10 }
  0x42   :  { %290 = vmatpush.msrb.mxu3 %v692_v10 }
  0x43   :  { %135 = vmatpush.msrb.mxu1 %v697_v12  ;;  %213 = vmatpush.msrb.mxu2 %v697_v12 }
  0x44   :  { %291 = vmatpush.msrb.mxu3 %v697_v12 }
  0x45   :  { %136 = vmatpush.msrb.mxu1 %v702_v14  ;;  %214 = vmatpush.msrb.mxu2 %v702_v14 }
  0x46   :  { %292 = vmatpush.msrb.mxu3 %v702_v14 }
  0x47   :  { %137 = vmatpush.msrb.mxu1 %v707_v16  ;;  %215 = vmatpush.msrb.mxu2 %v707_v16 }
  0x48   :  { %293 = vmatpush.msrb.mxu3 %v707_v16 }
  0x49   :  { %138 = vmatpush.msrb.mxu1 %v712_v18  ;;  %216 = vmatpush.msrb.mxu2 %v712_v18 }
  0x4a   :  { %294 = vmatpush.msrb.mxu3 %v712_v18 }
  0x4b   :  { %139 = vmatpush.msrb.mxu1 %v717_v20  ;;  %217 = vmatpush.msrb.mxu2 %v717_v20 }
  0x4c   :  { %295 = vmatpush.msrb.mxu3 %v717_v20 }
  0x4d   :  { %140 = vmatpush.msrb.mxu1 %v722_v22  ;;  %218 = vmatpush.msrb.mxu2 %v722_v22 }
  0x4e   :  { %296 = vmatpush.msrb.mxu3 %v722_v22 }
  0x4f   :  { %141 = vmatpush.msrb.mxu1 %v727_v24  ;;  %219 = vmatpush.msrb.mxu2 %v727_v24 }
  0x50   :  { %297 = vmatpush.msrb.mxu3 %v727_v24 }
  0x51   :  { %142 = vmatpush.msrb.mxu1 %v732_v25  ;;  %220 = vmatpush.msrb.mxu2 %v732_v25 }
  0x52   :  { %298 = vmatpush.msrb.mxu3 %v732_v25 }
  0x53   :  { %143 = vmatpush.msrb.mxu1 %v737_v26  ;;  %221 = vmatpush.msrb.mxu2 %v737_v26 }
  0x54   :  { %299 = vmatpush.msrb.mxu3 %v737_v26 }
  0x55   :  { %232 = vmatpush.msra.mxu1 %v666_v0 }
  0x57   :  { %233 = vmatpush.msra.mxu1 %v668_v1 }
  0x59   :  { %234 = vmatpush.msra.mxu1 %v672_v2 }
  0x5b   :  { %235 = vmatpush.msra.mxu1 %v677_v3 }
  0x5d   :  { %236 = vmatpush.msra.mxu1 %v682_v5 }
  0x5f   :  { %237 = vmatpush.msra.mxu1 %v687_v8 }
  0x61   :  { %238 = vmatpush.msra.mxu1 %v692_v10 }
  0x63   :  { %239 = vmatpush.msra.mxu1 %v697_v12 }
  0x65   :  { %240 = vmatpush.msra.mxu1 %v702_v14 }
  0x67   :  { %241 = vmatpush.msra.mxu1 %v707_v16 }
  0x69   :  { %242 = vmatpush.msra.mxu1 %v712_v18 }
  0x6b   :  { %243 = vmatpush.msra.mxu1 %v717_v20 }
  0x6d   :  { %244 = vmatpush.msra.mxu1 %v722_v22 }
  0x6f   :  { %245 = vmatpush.msra.mxu1 %v727_v24 }
  0x71   :  { %246 = vmatpush.msra.mxu1 %v732_v25 }
  0x73   :  { %247 = vmatpush.msra.mxu1 %v737_v26 }
  0xb1   :  { %v120_v34 = vpop.f32.mrf.mxu1 }
  0xb2   :  { %v123_v35 = vadd.f32 %v120_v34, %v102_v33 }
  0xb4   :  { %432 = vtanh.f32 %v123_v35 }
  0xba   :  { %v433_v36 = vpop.eup %432 }
  0xbb   :  { %144 = vmatmul.f32.vlgmr.msrb.gmra.mxu1 %v433_v36  ;;  %353 = vmatmul.f32.vlgmr.msra.gmra.mxu0 %v433_v36 }
 0x138   :  { %v145_v39 = vpop.f32.mrf.mxu1  ;;  %v354_v40 = vpop.f32.mrf.mxu0 }
 0x139   :  { %v148_v41 = vadd.f32 %v145_v39, %v127_v38  ;;  %v355_v42 = vadd.f32 %v813_v37, %v354_v40 }
 0x13b   :  { %434 = vtanh.f32 %v148_v41  ;;  %378 = vst [vmem:[#allocation11] sm:$0xff] %v355_v42 }
 0x141   :  { %v435_v43 = vpop.eup %434 }
 0x142   :  { %170 = vmatmul.f32.vlgmr.msra.gmra.mxu2 %v435_v43  ;;  %356 = vmatmul.f32.gmra.mxu0 %v435_v43 }
 0x143   :  { %258 = vmatpush.msra.mxu2 %v666_v0 }
 0x145   :  { %259 = vmatpush.msra.mxu2 %v668_v1 }
 0x147   :  { %260 = vmatpush.msra.mxu2 %v672_v2 }
 0x149   :  { %261 = vmatpush.msra.mxu2 %v677_v3 }
 0x14b   :  { %262 = vmatpush.msra.mxu2 %v682_v5 }
 0x14d   :  { %263 = vmatpush.msra.mxu2 %v687_v8 }
 0x14f   :  { %264 = vmatpush.msra.mxu2 %v692_v10 }
 0x151   :  { %265 = vmatpush.msra.mxu2 %v697_v12  ;;  %v283_v12 = vld [vmem:[#allocation3 + $0x38] sm:$0xff] }
 0x153   :  { %266 = vmatpush.msra.mxu2 %v702_v14 }
 0x155   :  { %267 = vmatpush.msra.mxu2 %v707_v16 }
 0x157   :  { %268 = vmatpush.msra.mxu2 %v712_v18 }
 0x159   :  { %269 = vmatpush.msra.mxu2 %v717_v20 }
 0x15b   :  { %270 = vmatpush.msra.mxu2 %v722_v22 }
 0x15d   :  { %271 = vmatpush.msra.mxu2 %v727_v24 }
 0x15f   :  { %272 = vmatpush.msra.mxu2 %v732_v25 }
 0x161   :  { %273 = vmatpush.msra.mxu2 %v737_v26 }
 0x1bf   :  { %v357_v44 = vpop.f32.mrf.mxu0 }
 0x1c0   :  { %v358_v45 = vadd.f32 %v813_v37, %v357_v44 }
 0x1c2   :  { %379 = vst [vmem:[#allocation11 + $0x8] sm:$0xff] %v358_v45 }
 0x1c5   :  { %v171_v47 = vpop.f32.mrf.mxu2 }
 0x1c6   :  { %v174_v48 = vadd.f32 %v171_v47, %v153_v46 }
 0x1c8   :  { %436 = vtanh.f32 %v174_v48 }
 0x1ce   :  { %v437_v49 = vpop.eup %436 }
 0x1cf   :  { %196 = vmatmul.f32.vlgmr.msra.gmra.mxu3 %v437_v49  ;;  %359 = vmatmul.f32.gmra.mxu0 %v437_v49 }
 0x24c   :  { %v360_v50 = vpop.f32.mrf.mxu0 }
 0x24d   :  { %v361_v51 = vadd.f32 %v813_v37, %v360_v50 }
 0x24f   :  { %380 = vst [vmem:[#allocation11 + $0x10] sm:$0xff] %v361_v51 }
 0x252   :  { %v197_v53 = vpop.f32.mrf.mxu3 }
 0x253   :  { %v200_v54 = vadd.f32 %v197_v53, %v179_v52 }
 0x255   :  { %438 = vtanh.f32 %v200_v54 }
 0x25b   :  { %v439_v55 = vpop.eup %438 }
 0x25c   :  { %222 = vmatmul.f32.vlgmr.msrb.gmra.mxu2 %v439_v55  ;;  %362 = vmatmul.f32.gmra.mxu0 %v439_v55 }
 0x2d9   :  { %v363_v56 = vpop.f32.mrf.mxu0 }
 0x2da   :  { %v364_v57 = vadd.f32 %v813_v37, %v363_v56 }
 0x2dc   :  { %381 = vst [vmem:[#allocation11 + $0x18] sm:$0xff] %v364_v57 }
 0x2df   :  { %v223_v59 = vpop.f32.mrf.mxu2 }
 0x2e0   :  { %v226_v60 = vadd.f32 %v223_v59, %v205_v58 }
 0x2e2   :  { %440 = vtanh.f32 %v226_v60 }
 0x2e8   :  { %v441_v61 = vpop.eup %440 }
 0x2e9   :  { %248 = vmatmul.f32.vlgmr.msra.gmra.mxu1 %v441_v61  ;;  %365 = vmatmul.f32.gmra.mxu0 %v441_v61 }
 0x366   :  { %v249_v63 = vpop.f32.mrf.mxu1  ;;  %v366_v0 = vpop.f32.mrf.mxu0 }
 0x367   :  { %v252_v1 = vadd.f32 %v249_v63, %v231_v62  ;;  %v367_v2 = vadd.f32 %v813_v37, %v366_v0 }
 0x369   :  { %442 = vtanh.f32 %v252_v1  ;;  %382 = vst [vmem:[#allocation11 + $0x20] sm:$0xff] %v367_v2 }
 0x36f   :  { %v443_v3 = vpop.eup %442 }
 0x370   :  { %274 = vmatmul.f32.vlgmr.msra.gmra.mxu2 %v443_v3  ;;  %368 = vmatmul.f32.gmra.mxu0 %v443_v3 }
 0x3ed   :  { %v369_v4 = vpop.f32.mrf.mxu0 }
 0x3ee   :  { %v370_v5 = vadd.f32 %v813_v37, %v369_v4 }
 0x3f0   :  { %383 = vst [vmem:[#allocation11 + $0x28] sm:$0xff] %v370_v5 }
 0x3f3   :  { %v275_v7 = vpop.f32.mrf.mxu2 }
 0x3f4   :  { %v278_v8 = vadd.f32 %v275_v7, %v257_v6 }
 0x3f6   :  { %444 = vtanh.f32 %v278_v8 }
 0x3fc   :  { %v445_v9 = vpop.eup %444 }
 0x3fd   :  { %300 = vmatmul.f32.vlgmr.msrb.gmra.mxu3 %v445_v9  ;;  %371 = vmatmul.f32.gmra.mxu0 %v445_v9 }
 0x47a   :  { %v372_v10 = vpop.f32.mrf.mxu0 }
 0x47b   :  { %v373_v11 = vadd.f32 %v813_v37, %v372_v10 }
 0x47d   :  { %384 = vst [vmem:[#allocation11 + $0x30] sm:$0xff] %v373_v11 }
 0x480   :  { %v301_v13 = vpop.f32.mrf.mxu3 }
 0x481   :  { %v304_v14 = vadd.f32 %v301_v13, %v283_v12 }
 0x483   :  { %446 = vtanh.f32 %v304_v14 }
 0x489   :  { %v447_v15 = vpop.eup %446 }
 0x48a   :  { %308 = vst [vmem:[#allocation12] sm:$0xff] %v447_v15  ;;  %374 = vmatmul.f32.gmra.mxu0 %v447_v15 }
 0x48b   :  { %409 = dma.vmem_to_hbm [thread:$0]  %s405_s17, 128, %s407_s20, [#allocation13]  }
 0x507   :  { %v375_v16 = vpop.f32.mrf.mxu0 }
 0x508   :  { %v376_v17 = vadd.f32 %v813_v37, %v375_v16 }
 0x50a   :  { %385 = vst [vmem:[#allocation11 + $0x38] sm:$0xff] %v376_v17 }
 0x50b   :  { %398 = dma.vmem_to_hbm [thread:$0]  %s391_s22, 1024, %s393_s25, [#allocation5], %s603_s29, %s603_s29, %s604_s30  }
 0x50c   :  { %598 = dma.done.wait [#allocation5], 1024  }
 0x50d   :  { %599 = vsyncadd [#allocation5], 4294966272 }
 0x50e   :  { %600 = dma.done.wait [#allocation13], 128  }
 0x50f   :  { %601 = vsyncadd [#allocation13], 4294967168 }
 0x510   :  { %418 = vsyncpa [#allocation4], 1 }
 0x511   :  { %419 = vsyncpa [#allocation7], 1 }
 0x512   :  { %420 = vsyncpa [#allocation10], 1 }
 0x513   :  { %421 = vsyncpa [#allocation5], 1 }
 0x514   :  { %422 = vsyncpa [#allocation13], 1 }

</bundles_post_ra>
